<compile_context>
chip_gen: v7x
topology: tpu7x:2x2x1
jax: 0.10.0
libtpu: 0.0.40
codegen_flags: <defaults>
</compile_context>

<pallas_src>
import functools
import math

import jax
import jax.numpy as jnp
from jax.experimental import pallas as pl
from jax.experimental.pallas import tpu as pltpu


def _round_up(x, m):
    return ((x + m - 1) // m) * m


def _sublane_for(dtype):
    # f32 -> 8, bf16 -> 16, int8/fp8 -> 32 (sub-32-bit packs along sublanes).
    itemsize = jnp.dtype(dtype).itemsize
    return max(8, 32 // itemsize)


def _vmem_budget_bytes():
    # Device-aware budget: 128 MiB physical on v5e/v6e, 64 MiB on v7x.
    try:
        cap = pltpu.get_tpu_info().vmem_capacity_bytes
    except Exception:
        cap = 64 * 1024 * 1024  # conservative (v7x-sized) fallback
    return int(cap * 0.5)  # leave headroom for compiler internals


def _ln_stats(x, eps, inv_h):
    # Fused single-pass mean / (biased) variance: var = E[x^2] - mean^2.
    s1 = jnp.sum(x, axis=-1, keepdims=True)
    s2 = jnp.sum(x * x, axis=-1, keepdims=True)
    mean = s1 * inv_h
    var = s2 * inv_h - mean * mean
    inv = jax.lax.rsqrt(jnp.maximum(var, 0.0) + eps)  # EUP
    return mean, inv


def _layernorm_bias_kernel(x_ref, w_ref, b_ref, o_ref, *, eps, inv_h):
    x = x_ref[...].astype(jnp.float32)          # (rt, H)
    w = w_ref[...].astype(jnp.float32)          # (1, H)
    b = b_ref[...].astype(jnp.float32)          # (1, H)
    mean, inv = _ln_stats(x, eps, inv_h)
    o_ref[...] = ((x - mean) * inv * w + b).astype(o_ref.dtype)


def _layernorm_nobias_kernel(x_ref, w_ref, o_ref, *, eps, inv_h):
    x = x_ref[...].astype(jnp.float32)          # (rt, H)
    w = w_ref[...].astype(jnp.float32)          # (1, H)
    mean, inv = _ln_stats(x, eps, inv_h)
    o_ref[...] = ((x - mean) * inv * w).astype(o_ref.dtype)


def layer_norm(x, weight, bias=None, *, eps=1e-5, row_tile=None):
    """LayerNorm over the last dim of x using a Pallas TPU kernel.

    x:      (..., H)
    weight: (H,)
    bias:   (H,) or None (None -> no bias, matching LayerNorm(ndim, bias=False))
    """
    orig_shape = x.shape
    H = orig_shape[-1]
    rows = int(math.prod(orig_shape[:-1])) if len(orig_shape) > 1 else 1

    x2 = x.reshape(rows, H)
    w2 = weight.reshape(1, H)

    itemsize = jnp.dtype(x.dtype).itemsize
    sublane = _sublane_for(x.dtype)
    vmem_budget = _vmem_budget_bytes()

    # --- row tile from the VMEM budget ---
    if row_tile is None:
        # Per-row cost: double-buffered input + output, plus ~4 f32 temporaries.
        per_row = H * (4 * itemsize + 4 * 4)
        rt = vmem_budget // max(per_row, 1)
        rt = (rt // sublane) * sublane
        rt = max(sublane, min(rt, 1024))
    else:
        rt = max(sublane, _round_up(int(row_tile), sublane))
    if rt >= rows:
        rt = rows  # single full-extent block (exempt from (8,128) divisibility)

    grid = (pl.cdiv(rows, rt),)

    has_bias = bias is not None
    if has_bias:
        kernel = functools.partial(_layernorm_bias_kernel, eps=eps, inv_h=1.0 / H)
        operands = (x2, w2, bias.reshape(1, H))
        in_specs = [
            pl.BlockSpec((rt, H), lambda i: (i, 0)),
            pl.BlockSpec((1, H), lambda i: (0, 0)),   # weight: resident
            pl.BlockSpec((1, H), lambda i: (0, 0)),   # bias: resident
        ]
    else:
        kernel = functools.partial(_layernorm_nobias_kernel, eps=eps, inv_h=1.0 / H)
        operands = (x2, w2)
        in_specs = [
            pl.BlockSpec((rt, H), lambda i: (i, 0)),
            pl.BlockSpec((1, H), lambda i: (0, 0)),   # weight: resident
        ]

    param_bytes = (2 if has_bias else 1) * H * jnp.dtype(weight.dtype).itemsize
    cost = pl.CostEstimate(
        flops=8 * rows * H,
        transcendentals=rows,
        bytes_accessed=2 * rows * H * itemsize + param_bytes,
    )

    out = pl.pallas_call(
        kernel,
        out_shape=jax.ShapeDtypeStruct((rows, H), x.dtype),
        grid_spec=pltpu.PrefetchScalarGridSpec(
            num_scalar_prefetch=0,
            grid=grid,
            in_specs=in_specs,
            out_specs=pl.BlockSpec((rt, H), lambda i: (i, 0)),
        ),
        compiler_params=pltpu.CompilerParams(
            dimension_semantics=("parallel",),
            vmem_limit_bytes=vmem_budget,
        ),
        cost_estimate=cost,
    )(*operands)

    return out.reshape(orig_shape)


def _reference_layer_norm(x, weight, bias, eps=1e-5):
    mean = jnp.mean(x, axis=-1, keepdims=True)
    var = jnp.mean((x - mean) ** 2, axis=-1, keepdims=True)
    y = (x - mean) * jax.lax.rsqrt(var + eps) * weight
    if bias is not None:
        y = y + bias
    return y


if __name__ == "__main__":
    key = jax.random.PRNGKey(0)

    # Shapes consistent with the module's usage: (batch, seq, hidden).
    batch, seq, hidden = 2, 8, 32
    x = jax.random.normal(key, (batch, seq, hidden), dtype=jnp.float32)

    # Deterministic params, matching nn.Parameter(torch.ones/zeros(ndim)).
    weight = jnp.ones((hidden,), dtype=jnp.float32)
    bias = jnp.zeros((hidden,), dtype=jnp.float32)

    # bias=True case
    y = layer_norm(x, weight, bias)
    jax.block_until_ready(y)
    y_ref = _reference_layer_norm(x, weight, bias)
    assert jnp.allclose(y, y_ref, atol=1e-5, rtol=1e-5), "mismatch (bias=True)"

    # bias=False case (LayerNorm(ndim, bias=False))
    y_nb = layer_norm(x, weight, None)
    jax.block_until_ready(y_nb)
    y_nb_ref = _reference_layer_norm(x, weight, None)
    assert jnp.allclose(y_nb, y_nb_ref, atol=1e-5, rtol=1e-5), "mismatch (bias=False)"

    # Non-128 hidden, non-multiple-of-8 rows (full-extent block path): (3,5,96).
    x2 = jax.random.normal(jax.random.PRNGKey(1), (3, 5, 96), dtype=jnp.float32)
    w2 = jax.random.normal(jax.random.PRNGKey(2), (96,), dtype=jnp.float32)
    b2 = jax.random.normal(jax.random.PRNGKey(3), (96,), dtype=jnp.float32)
    y2 = layer_norm(x2, w2, b2)
    jax.block_until_ready(y2)
    y2_ref = _reference_layer_norm(x2, w2, b2)
    assert jnp.allclose(y2, y2_ref, atol=1e-5, rtol=1e-5), "mismatch (ragged full-block)"

    # Ragged-grid path: rows=40 with row_tile=16 -> grid=3, masked last block.
    x3 = jax.random.normal(jax.random.PRNGKey(4), (5, 8, 128), dtype=jnp.float32)
    w3 = jax.random.normal(jax.random.PRNGKey(5), (128,), dtype=jnp.float32)
    b3 = jax.random.normal(jax.random.PRNGKey(6), (128,), dtype=jnp.float32)
    y3 = layer_norm(x3, w3, b3, row_tile=16)
    jax.block_until_ready(y3)
    y3_ref = _reference_layer_norm(x3, w3, b3)
    assert jnp.allclose(y3, y3_ref, atol=1e-5, rtol=1e-5), "mismatch (ragged grid)"

    print("KERNEL_OK")
</pallas_src>

<mosaic_0001>
module attributes {stable_mosaic.version = 11 : i64} {
  func.func @_layernorm_bias_kernel(%arg0: i32, %arg1: memref<16x32xf32, #tpu.memory_space<vmem>>, %arg2: memref<1x32xf32, #tpu.memory_space<vmem>>, %arg3: memref<1x32xf32, #tpu.memory_space<vmem>>, %arg4: memref<16x32xf32, #tpu.memory_space<vmem>>) attributes {dimension_semantics = [#tpu.dimension_semantics<parallel>], iteration_bounds = array<i64: 1>, scalar_prefetch = 0 : i64, scratch_operands = 0 : i64, tpu.core_type = #tpu.core_type<tc>, window_params = [{transform_indices = @transform_0, window_bounds = array<i64: 16, 32>}, {pipeline_mode = #tpu.pipeline_mode<synchronous>, transform_indices = @transform_1, window_bounds = array<i64: 1, 32>}, {pipeline_mode = #tpu.pipeline_mode<synchronous>, transform_indices = @transform_2, window_bounds = array<i64: 1, 32>}, {transform_indices = @transform_3, window_bounds = array<i64: 16, 32>}]} {
    %c0 = arith.constant 0 : index
    %c0_0 = arith.constant 0 : index
    %0 = vector.load %arg1[%c0, %c0_0] : memref<16x32xf32, #tpu.memory_space<vmem>>, vector<16x32xf32>
    %c0_1 = arith.constant 0 : index
    %c0_2 = arith.constant 0 : index
    %1 = vector.load %arg2[%c0_1, %c0_2] : memref<1x32xf32, #tpu.memory_space<vmem>>, vector<1x32xf32>
    %c0_3 = arith.constant 0 : index
    %c0_4 = arith.constant 0 : index
    %2 = vector.load %arg3[%c0_3, %c0_4] : memref<1x32xf32, #tpu.memory_space<vmem>>, vector<1x32xf32>
    %cst = arith.constant dense<0.000000e+00> : vector<16xf32>
    %3 = vector.multi_reduction <add>, %0, %cst [1] : vector<16x32xf32> to vector<16xf32>
    %4 = vector.shape_cast %3 : vector<16xf32> to vector<16x1xf32>
    %5 = arith.mulf %0, %0 : vector<16x32xf32>
    %cst_5 = arith.constant dense<0.000000e+00> : vector<16xf32>
    %6 = vector.multi_reduction <add>, %5, %cst_5 [1] : vector<16x32xf32> to vector<16xf32>
    %7 = vector.shape_cast %6 : vector<16xf32> to vector<16x1xf32>
    %cst_6 = arith.constant 3.125000e-02 : f32
    %8 = vector.broadcast %cst_6 : f32 to vector<16x1xf32>
    %9 = arith.mulf %4, %8 : vector<16x1xf32>
    %cst_7 = arith.constant 3.125000e-02 : f32
    %10 = vector.broadcast %cst_7 : f32 to vector<16x1xf32>
    %11 = arith.mulf %7, %10 : vector<16x1xf32>
    %12 = arith.mulf %9, %9 : vector<16x1xf32>
    %13 = arith.subf %11, %12 : vector<16x1xf32>
    %cst_8 = arith.constant 0.000000e+00 : f32
    %14 = vector.broadcast %cst_8 : f32 to vector<16x1xf32>
    %15 = arith.maximumf %13, %14 : vector<16x1xf32>
    %cst_9 = arith.constant 9.99999974E-6 : f32
    %16 = vector.broadcast %cst_9 : f32 to vector<16x1xf32>
    %17 = arith.addf %15, %16 : vector<16x1xf32>
    %18 = math.rsqrt %17 : vector<16x1xf32>
    %19 = vector.broadcast %9 : vector<16x1xf32> to vector<16x32xf32>
    %20 = arith.subf %0, %19 : vector<16x32xf32>
    %21 = vector.broadcast %18 : vector<16x1xf32> to vector<16x32xf32>
    %22 = arith.mulf %20, %21 : vector<16x32xf32>
    %23 = vector.broadcast %1 : vector<1x32xf32> to vector<16x32xf32>
    %24 = arith.mulf %22, %23 : vector<16x32xf32>
    %25 = vector.broadcast %2 : vector<1x32xf32> to vector<16x32xf32>
    %26 = arith.addf %24, %25 : vector<16x32xf32>
    %c0_10 = arith.constant 0 : index
    %c0_11 = arith.constant 0 : index
    %27 = vector.load %arg4[%c0_10, %c0_11] : memref<16x32xf32, #tpu.memory_space<vmem>>, vector<16x32xf32>
    tpu.vector_store %arg4[%c0_10, %c0_11], %26 {strides = array<i32>} : memref<16x32xf32, #tpu.memory_space<vmem>>, vector<16x32xf32>,
    return
  }
  func.func @transform_0(%arg0: i32) -> (i32, i32) {
    %c0_i32 = arith.constant 0 : i32
    %c0_i32_0 = arith.constant 0 : i32
    return %arg0, %c0_i32 : i32, i32
  }
  func.func @transform_1(%arg0: i32) -> (i32, i32) {
    %c0_i32 = arith.constant 0 : i32
    %c0_i32_0 = arith.constant 0 : i32
    %c0_i32_1 = arith.constant 0 : i32
    return %c0_i32, %c0_i32_0 : i32, i32
  }
  func.func @transform_2(%arg0: i32) -> (i32, i32) {
    %c0_i32 = arith.constant 0 : i32
    %c0_i32_0 = arith.constant 0 : i32
    %c0_i32_1 = arith.constant 0 : i32
    return %c0_i32, %c0_i32_0 : i32, i32
  }
  func.func @transform_3(%arg0: i32) -> (i32, i32) {
    %c0_i32 = arith.constant 0 : i32
    %c0_i32_0 = arith.constant 0 : i32
    return %arg0, %c0_i32 : i32, i32
  }
}

</mosaic_0001>

<bundles_post_ra>
// kernel: tpu_custom_call.1
= control target key start
LH: loop header
LB: loop body
LE: loop exit
PB: predicated region body
PF: predicated region fallthrough
CT: control target
= control target key end

     0   :  { %8 = vsyncpa [#allocation3], 0  ;;  %s225_s0 = inlined_call_operand.hbm [shape: f32[16,32], index: 0, kind: input, shape index: {}]   ;;  %s226_s1 = inlined_call_operand.vmem [shape: f32[1,32], index: 1, kind: input, shape index: {}]   ;;  %s227_s2 = inlined_call_operand.vmem [shape: f32[1,32], index: 2, kind: input, shape index: {}]   ;;  %s228_s3 = inlined_call_operand.hbm [shape: f32[16,32], index: 3, kind: output, shape index: {}]  }
   0x1   :  { %9 = vsyncpa [#allocation4], 0  ;;  %s159_s12 = smov [#allocation2]   ;;  %s111_s16 = scalar_lea.hbm %s225_s0, 256 }
   0x2   :  { %s15_s13 = sshll.u32 %s159_s12, 4  ;;  %p112_p0 = scmp.ne.s32.totalorder %s225_s0, %s111_s16  ;;  %s16_s13 = int_to_ptr.vmem [resolvable:$true] %s15_s13 }
   0x3   :  { %p115_p1 = scmp.lt.u32.totalorder %s111_s16, %s225_s0 }
   0x5   :  { %p117_p2 = pnand %p115_p1, %p112_p0 }
   0x7   :  { %120 = shalt.err (!%p117_p2)
}
   0x8   :  { %s121_s21 = scalar_lea.vmem %s16_s13, 256  ;;  %p126_p4 = scmp.lt.s32.totalorder %s16_s13, %s16_s13 }
   0x9   :  { %p122_p3 = scmp.ne.s32.totalorder %s16_s13, %s121_s21  ;;  %p127_p5 = scmp.lt.s32.totalorder %s121_s21, %s121_s21 }
   0xb   :  { %p128_p6 = por %p127_p5, %p126_p4 }
   0xd   :  { %p129_p7 = pnand %p128_p6, %p122_p3 }
   0xf   :  { %132 = shalt.err (!%p129_p7)
}
  0x10   :  { %s160_s22 = smov 128   ;;  %s161_s23 = smov 8  }
  0x11   :  { %21 = dma.hbm_to_vmem [thread:$0]  %s225_s0, 256, %s16_s13, [#allocation3], %s160_s22, %s160_s22, %s161_s23  }
  0x12   :  { %155 = dma.done.wait [#allocation3], 256  }
  0x13   :  { %156 = vsyncadd [#allocation3], 4294967040  ;;  %vm33_vm0 = vcmask 261120   ;;  %v29_v0 = vld [vmem:[#allocation2] sm:$0xff]  ;;  %v30_v1 = vld [vmem:[#allocation2 + $0x8] sm:$0xff]  ;;  %s162_s29 = smov [#allocation5]  }
  0x14   :  { %v34_v2 = vsel %vm33_vm0, %v29_v0, 0.0  ;;  %v40_v3 = vmul.f32 %v29_v0, %v29_v0  ;;  %v41_v4 = vmul.f32 %v30_v1, %v30_v1  ;;  %v37_v6 = vsel %vm33_vm0, %v30_v1, 0.0  ;;  %v101_v26 = vld [vmem:[%s226_s1] ss:$0 sm:$0xff]  ;;  %s89_s30 = sshll.u32 %s162_s29, 4  ;;  %s90_s30 = int_to_ptr.vmem [resolvable:$true] %s89_s30 }
  0x15   :  { %35 = vadd.xlane.f32.xlu0 %v34_v2  ;;  %v102_v28 = vld [vmem:[%s227_s2] ss:$0 sm:$0xff]  ;;  %s133_s1 = scalar_lea.vmem %s90_s30, 256  ;;  %p138_p9 = scmp.lt.s32.totalorder %s90_s30, %s90_s30 }
  0x16   :  { %v42_v5 = vsel %vm33_vm0, %v40_v3, 0.0  ;;  %v45_v7 = vsel %vm33_vm0, %v41_v4, 0.0  ;;  %p134_p8 = scmp.ne.s32.totalorder %s90_s30, %s133_s1  ;;  %p139_p10 = scmp.lt.s32.totalorder %s133_s1, %s133_s1 }
  0x17   :  { %43 = vadd.xlane.f32.xlu1 %v42_v5 }
  0x18   :  { %p140_p11 = por %p139_p10, %p138_p9 }
  0x19   :  { %38 = vadd.xlane.f32.xlu0 %v37_v6 }
  0x1a   :  { %p141_p12 = pnand %p140_p11, %p134_p8 }
  0x1b   :  { %46 = vadd.xlane.f32.xlu1 %v45_v7 }
  0xa2   :  { %v36_v8 = vpop.xlane.xlu0 %35 }
  0xa3   :  { %v48_v9 = vmul.f32 0.03125, %v36_v8 }
  0xa4   :  { %v44_v10 = vpop.xlane.xlu1 %43 }
  0xa5   :  { %v52_v11 = vmul.f32 %v48_v9, %v48_v9  ;;  %v50_v12 = vmul.f32 0.03125, %v44_v10  ;;  %v62_v24 = vsub.f32 %v29_v0, %v48_v9 }
  0xa6   :  { %v39_v13 = vpop.xlane.xlu0 %38 }
  0xa7   :  { %v54_v14 = vsub.f32 %v50_v12, %v52_v11  ;;  %v49_v15 = vmul.f32 0.03125, %v39_v13 }
  0xa8   :  { %v47_v16 = vpop.xlane.xlu1 %46 }
  0xa9   :  { %v56_v17 = vmax.f32 %v54_v14, 0.0  ;;  %v53_v18 = vmul.f32 %v49_v15, %v49_v15  ;;  %v51_v19 = vmul.f32 0.03125, %v47_v16  ;;  %v63_v29 = vsub.f32 %v30_v1, %v49_v15 }
  0xab   :  { %v58_v20 = vadd.f32 1e-05, %v56_v17  ;;  %v55_v21 = vsub.f32 %v51_v19, %v53_v18 }
  0xad   :  { %107 = vrsqrt.f32 %v58_v20  ;;  %v57_v22 = vmax.f32 %v55_v21, 0.0 }
  0xaf   :  { %v59_v23 = vadd.f32 1e-05, %v57_v22 }
  0xb1   :  { %109 = vrsqrt.f32 %v59_v23 }
  0xb7   :  { %v108_v25 = vpop.eup %107 }
  0xb8   :  { %v64_v27 = vmul.f32 %v108_v25, %v62_v24 }
  0xba   :  { %v72_v30 = vmul.f32 %v101_v26, %v64_v27 }
  0xbb   :  { %v110_v31 = vpop.eup %109 }
  0xbc   :  { %v65_v32 = vmul.f32 %v110_v31, %v63_v29  ;;  %v80_v33 = vadd.f32 %v102_v28, %v72_v30 }
  0xbe   :  { %v73_v34 = vmul.f32 %v101_v26, %v65_v32  ;;  %82 = vst.msk [vmem:[#allocation5] sm:$0xff] %vm33_vm0, %v80_v33 }
  0xc0   :  { %v81_v35 = vadd.f32 %v102_v28, %v73_v34 }
  0xc2   :  { %83 = vst.msk [vmem:[#allocation5 + $0x8] sm:$0xff] %vm33_vm0, %v81_v35 }
  0xc3   :  { %144 = shalt.err (!%p141_p12)
}
  0xc4   :  { %s145_s5 = scalar_lea.hbm %s228_s3, 256 }
  0xc5   :  { %p146_p13 = scmp.ne.s32.totalorder %s228_s3, %s145_s5  ;;  %p149_p0 = scmp.lt.u32.totalorder %s145_s5, %s228_s3 }
  0xc7   :  { %p151_p1 = pnand %p149_p0, %p146_p13 }
  0xc9   :  { %154 = shalt.err (!%p151_p1)
}
  0xca   :  { %95 = dma.vmem_to_hbm [thread:$0]  %s90_s30, 256, %s228_s3, [#allocation4], %s160_s22, %s160_s22, %s161_s23  }
  0xcb   :  { %157 = dma.done.wait [#allocation4], 256  }
  0xcc   :  { %158 = vsyncadd [#allocation4], 4294967040 }
  0xcd   :  { %99 = vsyncpa [#allocation3], 1 }
  0xce   :  { %100 = vsyncpa [#allocation4], 1 }

</bundles_post_ra>
